<compile_context>
chip_gen: v7x
topology: tpu7x:2x2x1
jax: 0.10.0
libtpu: 0.0.40
codegen_flags: <defaults>
</compile_context>

<pallas_src>
import jax
import jax.numpy as jnp
from jax import lax
from jax.experimental import pallas as pl
from jax.experimental.pallas import tpu as pltpu


def _conv_block_kernel(xp_ref, w3_ref, wr_ref, b_ref, o_ref):
    # xp_ref: (1, Hp, Wp*Cin)      padded input tile (bf16), one batch element
    # w3_ref: (K, Wp*Cin, W*Cout)  3x3 conv weights, BN1 scale + kw taps folded in (bf16)
    # wr_ref: (Wp*Cin, W*Cout)     1x1 residual conv weights, BN2 scale folded in (bf16)
    # b_ref : (2, W*Cout)          row 0 = BN1 shift, row 1 = BN2 shift (tiled over w), f32
    # o_ref : (1, H, W*Cout)       output tile (lane-dense)
    K = w3_ref.shape[0]
    H = o_ref.shape[1]
    p = (K - 1) // 2

    # 3x3 conv as K contiguous row-block matmuls on the MXU, f32 accumulation.
    acc = jnp.zeros(o_ref.shape[1:], jnp.float32)
    for kh in range(K):  # static unroll, K = 3
        acc = acc + jnp.dot(xp_ref[0, kh:kh + H, :], w3_ref[kh],
                            preferred_element_type=jnp.float32)

    # folded BN1 shift + LeakyReLU(0.1)
    conv = acc + b_ref[0:1, :]
    conv = jnp.where(conv >= 0, conv, 0.1 * conv)

    # residual branch: 1x1 conv on the interior rows of the same padded tile + BN2 shift
    res = jnp.dot(xp_ref[0, p:p + H, :], wr_ref[...],
                  preferred_element_type=jnp.float32) + b_ref[1:2, :]

    o_ref[0] = (conv + res).astype(o_ref.dtype)


def convolution_block(x_nchw, w3_oihw, wr_oihw, bn1, bn2, *,
                      padding=1, eps=1e-5, use_bf16=True):
    """Forward of ConvolutionBlock (eval-mode BN). x_nchw: (N, Cin, H, W). Returns NCHW."""
    N, Cin, H, W = x_nchw.shape
    Cout, _, K, K2 = w3_oihw.shape
    assert K == K2, "square kernels only"
    assert padding == (K - 1) // 2, "wrapper assumes 'same' padding with stride 1"
    p = padding
    Hp, Wp = H + 2 * p, W + 2 * p
    mxu_dtype = jnp.bfloat16 if use_bf16 else jnp.float32

    # ---- fold eval-mode BatchNorm into per-channel scale/shift ----
    def fold(bn):
        gamma, beta, mean, var = bn
        scale = gamma / jnp.sqrt(var + eps)
        shift = beta - mean * scale
        return scale.astype(jnp.float32), shift.astype(jnp.float32)

    s1, b1 = fold(bn1)
    if wr_oihw is None:                         # identity residual (Cin == Cout)
        assert Cin == Cout
        wrf = jnp.eye(Cin, dtype=jnp.float32)
        b2 = jnp.zeros((Cout,), jnp.float32)
    else:
        s2, b2 = fold(bn2)
        wrf = jnp.transpose(wr_oihw[:, :, 0, 0], (1, 0)).astype(jnp.float32) * s2[None, :]

    # 3x3 weights: OIHW -> HWIO (kh, kw, ci, co), fold BN1 scale into output channels.
    w3f = jnp.transpose(w3_oihw, (2, 3, 1, 0)).astype(jnp.float32) * s1[None, None, None, :]

    # ---- fold the kw taps into block-banded matrices over the flattened (Wp*Cin) axis ----
    # w3_big[kh, r*Cin+ci, w*Cout+co] = w3f[kh, r-w, ci, co] if 0 <= r-w < K else 0
    S = (jnp.arange(W)[:, None, None] + jnp.arange(K)[None, :, None]
         == jnp.arange(Wp)[None, None, :]).astype(jnp.float32)                  # (W, K, Wp)
    w3_big = jnp.einsum('wkr,hkio->hriwo', S, w3f).reshape(K, Wp * Cin, W * Cout)

    # wr_big[r*Cin+ci, w*Cout+co] = wrf[ci, co] if r == w + p else 0
    Sr = (jnp.arange(W)[:, None] + p == jnp.arange(Wp)[None, :]).astype(jnp.float32)  # (W, Wp)
    wr_big = jnp.einsum('wr,io->riwo', Sr, wrf).reshape(Wp * Cin, W * Cout)

    # biases, tiled to the (w*Cout + co) output layout and packed into one small operand
    b_packed = jnp.stack([jnp.tile(b1, W), jnp.tile(b2, W)], axis=0)            # (2, W*Cout)

    # ---- input: NCHW -> NHWC -> pad -> flatten (Wp, Cin) into lanes; cast for the MXU ----
    x = jnp.transpose(x_nchw, (0, 2, 3, 1)).astype(jnp.float32)
    xp = jnp.pad(x, ((0, 0), (p, p), (p, p), (0, 0))).reshape(N, Hp, Wp * Cin)

    xp = xp.astype(mxu_dtype)
    w3_big = w3_big.astype(mxu_dtype)
    wr_big = wr_big.astype(mxu_dtype)

    out = pl.pallas_call(
        _conv_block_kernel,
        out_shape=jax.ShapeDtypeStruct((N, H, W * Cout), jnp.float32),
        grid_spec=pltpu.PrefetchScalarGridSpec(
            num_scalar_prefetch=0,
            grid=(N,),
            in_specs=[
                pl.BlockSpec((1, Hp, Wp * Cin), lambda n: (n, 0, 0)),
                pl.BlockSpec((K, Wp * Cin, W * Cout), lambda n: (0, 0, 0)),
                pl.BlockSpec((Wp * Cin, W * Cout), lambda n: (0, 0)),
                pl.BlockSpec((2, W * Cout), lambda n: (0, 0)),
            ],
            out_specs=pl.BlockSpec((1, H, W * Cout), lambda n: (n, 0, 0)),
        ),
        compiler_params=pltpu.CompilerParams(dimension_semantics=("parallel",)),
    )(xp, w3_big, wr_big, b_packed)

    # (N, H, W*Cout) -> (N, H, W, Cout) -> NCHW
    return jnp.transpose(out.reshape(N, H, W, Cout), (0, 3, 1, 2))


def _reference(x_nchw, w3_oihw, wr_oihw, bn1, bn2, *, padding=1, eps=1e-5):
    """Pure-JAX reference (lax.conv, f32) mirroring the PyTorch module in eval mode."""
    dn = ("NCHW", "OIHW", "NCHW")

    def bn_apply(y, bn):
        gamma, beta, mean, var = bn
        sc = (gamma / jnp.sqrt(var + eps)).reshape(1, -1, 1, 1)
        sh = (beta - mean * gamma / jnp.sqrt(var + eps)).reshape(1, -1, 1, 1)
        return y * sc + sh

    y = lax.conv_general_dilated(x_nchw, w3_oihw, (1, 1),
                                 ((padding, padding), (padding, padding)),
                                 dimension_numbers=dn)
    y = bn_apply(y, bn1)
    y = jnp.where(y >= 0, y, 0.1 * y)

    r = lax.conv_general_dilated(x_nchw, wr_oihw, (1, 1), ((0, 0), (0, 0)),
                                 dimension_numbers=dn)
    r = bn_apply(r, bn2)
    return y + r


if __name__ == "__main__":
    key = jax.random.PRNGKey(0)
    k_x, k_w3, k_wr, k_bn1, k_bn2 = jax.random.split(key, 5)

    N, Cin, Cout, H, W = 2, 4, 8, 16, 16
    KSZ = 3

    x = jax.random.normal(k_x, (N, Cin, H, W), jnp.float32)
    w3 = jax.random.normal(k_w3, (Cout, Cin, KSZ, KSZ), jnp.float32) * 0.1   # OIHW
    wr = jax.random.normal(k_wr, (Cout, Cin, 1, 1), jnp.float32) * 0.1       # OIHW (1x1)

    def make_bn(k):
        k1, k2, k3, k4 = jax.random.split(k, 4)
        gamma = 1.0 + 0.1 * jax.random.normal(k1, (Cout,), jnp.float32)
        beta = 0.1 * jax.random.normal(k2, (Cout,), jnp.float32)
        mean = 0.1 * jax.random.normal(k3, (Cout,), jnp.float32)
        var = jnp.abs(1.0 + 0.1 * jax.random.normal(k4, (Cout,), jnp.float32))
        return (gamma, beta, mean, var)

    bn1 = make_bn(k_bn1)
    bn2 = make_bn(k_bn2)

    out = convolution_block(x, w3, wr, bn1, bn2)
    out = jax.block_until_ready(out)

    ref = _reference(x, w3, wr, bn1, bn2)
    assert out.shape == (N, Cout, H, W)
    # bf16 MXU inputs (f32 accumulation) -> relaxed tolerance vs the f32 reference.
    assert jnp.allclose(out, ref, rtol=3e-2, atol=3e-2), "Pallas kernel mismatch vs reference"

    print("KERNEL_OK")
</pallas_src>

<mosaic_0001>
module attributes {stable_mosaic.version = 11 : i64} {
  func.func @_conv_block_kernel(%arg0: i32, %arg1: memref<1x18x72xbf16, #tpu.memory_space<vmem>>, %arg2: memref<3x72x128xbf16, #tpu.memory_space<vmem>>, %arg3: memref<72x128xbf16, #tpu.memory_space<vmem>>, %arg4: memref<2x128xf32, #tpu.memory_space<vmem>>, %arg5: memref<1x16x128xf32, #tpu.memory_space<vmem>>) attributes {dimension_semantics = [#tpu.dimension_semantics<parallel>], iteration_bounds = array<i64: 2>, scalar_prefetch = 0 : i64, scratch_operands = 0 : i64, tpu.core_type = #tpu.core_type<tc>, window_params = [{transform_indices = @transform_0, window_bounds = array<i64: 1, 18, 72>}, {pipeline_mode = #tpu.pipeline_mode<synchronous>, transform_indices = @transform_1, window_bounds = array<i64: 3, 72, 128>}, {pipeline_mode = #tpu.pipeline_mode<synchronous>, transform_indices = @transform_2, window_bounds = array<i64: 72, 128>}, {pipeline_mode = #tpu.pipeline_mode<synchronous>, transform_indices = @transform_3, window_bounds = array<i64: 2, 128>}, {transform_indices = @transform_4, window_bounds = array<i64: 1, 16, 128>}]} {
    %cst = arith.constant 0.000000e+00 : f32
    %0 = vector.broadcast %cst : f32 to vector<16x128xf32>
    %c0 = arith.constant 0 : index
    %c0_0 = arith.constant 0 : index
    %c0_1 = arith.constant 0 : index
    %1 = vector.load %arg1[%c0, %c0_0, %c0_1] : memref<1x18x72xbf16, #tpu.memory_space<vmem>>, vector<1x16x72xbf16>
    %2 = vector.shape_cast %1 : vector<1x16x72xbf16> to vector<16x72xbf16>
    %c0_2 = arith.constant 0 : index
    %c0_3 = arith.constant 0 : index
    %c0_4 = arith.constant 0 : index
    %3 = vector.load %arg2[%c0_2, %c0_3, %c0_4] : memref<3x72x128xbf16, #tpu.memory_space<vmem>>, vector<1x72x128xbf16>
    %4 = vector.shape_cast %3 : vector<1x72x128xbf16> to vector<72x128xbf16>
    %cst_5 = arith.constant dense<0.000000e+00> : vector<16x128xf32>
    %5 = tpu.matmul %2, %4, %cst_5 {dimension_numbers = #tpu.dot_dimension_numbers<[1], [0], [0], [1], [0, 0, 1, 1], [], []>} : vector<16x72xbf16>, vector<72x128xbf16>, vector<16x128xf32> -> vector<16x128xf32>
    %6 = arith.addf %0, %5 : vector<16x128xf32>
    %c0_6 = arith.constant 0 : index
    %c1 = arith.constant 1 : index
    %c0_7 = arith.constant 0 : index
    %7 = vector.load %arg1[%c0_6, %c1, %c0_7] : memref<1x18x72xbf16, #tpu.memory_space<vmem>>, vector<1x16x72xbf16>
    %8 = vector.shape_cast %7 : vector<1x16x72xbf16> to vector<16x72xbf16>
    %c1_8 = arith.constant 1 : index
    %c0_9 = arith.constant 0 : index
    %c0_10 = arith.constant 0 : index
    %9 = vector.load %arg2[%c1_8, %c0_9, %c0_10] : memref<3x72x128xbf16, #tpu.memory_space<vmem>>, vector<1x72x128xbf16>
    %10 = vector.shape_cast %9 : vector<1x72x128xbf16> to vector<72x128xbf16>
    %cst_11 = arith.constant dense<0.000000e+00> : vector<16x128xf32>
    %11 = tpu.matmul %8, %10, %cst_11 {dimension_numbers = #tpu.dot_dimension_numbers<[1], [0], [0], [1], [0, 0, 1, 1], [], []>} : vector<16x72xbf16>, vector<72x128xbf16>, vector<16x128xf32> -> vector<16x128xf32>
    %12 = arith.addf %6, %11 : vector<16x128xf32>
    %c0_12 = arith.constant 0 : index
    %c2 = arith.constant 2 : index
    %c0_13 = arith.constant 0 : index
    %13 = vector.load %arg1[%c0_12, %c2, %c0_13] : memref<1x18x72xbf16, #tpu.memory_space<vmem>>, vector<1x16x72xbf16>
    %14 = vector.shape_cast %13 : vector<1x16x72xbf16> to vector<16x72xbf16>
    %c2_14 = arith.constant 2 : index
    %c0_15 = arith.constant 0 : index
    %c0_16 = arith.constant 0 : index
    %15 = vector.load %arg2[%c2_14, %c0_15, %c0_16] : memref<3x72x128xbf16, #tpu.memory_space<vmem>>, vector<1x72x128xbf16>
    %16 = vector.shape_cast %15 : vector<1x72x128xbf16> to vector<72x128xbf16>
    %cst_17 = arith.constant dense<0.000000e+00> : vector<16x128xf32>
    %17 = tpu.matmul %14, %16, %cst_17 {dimension_numbers = #tpu.dot_dimension_numbers<[1], [0], [0], [1], [0, 0, 1, 1], [], []>} : vector<16x72xbf16>, vector<72x128xbf16>, vector<16x128xf32> -> vector<16x128xf32>
    %18 = arith.addf %12, %17 : vector<16x128xf32>
    %c0_18 = arith.constant 0 : index
    %c0_19 = arith.constant 0 : index
    %19 = vector.load %arg4[%c0_18, %c0_19] : memref<2x128xf32, #tpu.memory_space<vmem>>, vector<1x128xf32>
    %20 = vector.broadcast %19 : vector<1x128xf32> to vector<16x128xf32>
    %21 = arith.addf %18, %20 : vector<16x128xf32>
    %cst_20 = arith.constant 0.000000e+00 : f32
    %22 = vector.broadcast %cst_20 : f32 to vector<16x128xf32>
    %23 = arith.cmpf oge, %21, %22 : vector<16x128xf32>
    %cst_21 = arith.constant 1.000000e-01 : f32
    %24 = vector.broadcast %cst_21 : f32 to vector<16x128xf32>
    %25 = arith.mulf %24, %21 : vector<16x128xf32>
    %26 = arith.select %23, %21, %25 : vector<16x128xi1>, vector<16x128xf32>
    %c0_22 = arith.constant 0 : index
    %c1_23 = arith.constant 1 : index
    %c0_24 = arith.constant 0 : index
    %27 = vector.load %arg1[%c0_22, %c1_23, %c0_24] : memref<1x18x72xbf16, #tpu.memory_space<vmem>>, vector<1x16x72xbf16>
    %28 = vector.shape_cast %27 : vector<1x16x72xbf16> to vector<16x72xbf16>
    %c0_25 = arith.constant 0 : index
    %c0_26 = arith.constant 0 : index
    %29 = vector.load %arg3[%c0_25, %c0_26] : memref<72x128xbf16, #tpu.memory_space<vmem>>, vector<72x128xbf16>
    %cst_27 = arith.constant dense<0.000000e+00> : vector<16x128xf32>
    %30 = tpu.matmul %28, %29, %cst_27 {dimension_numbers = #tpu.dot_dimension_numbers<[1], [0], [0], [1], [0, 0, 1, 1], [], []>} : vector<16x72xbf16>, vector<72x128xbf16>, vector<16x128xf32> -> vector<16x128xf32>
    %c1_28 = arith.constant 1 : index
    %c0_29 = arith.constant 0 : index
    %31 = vector.load %arg4[%c1_28, %c0_29] : memref<2x128xf32, #tpu.memory_space<vmem>>, vector<1x128xf32>
    %32 = vector.broadcast %31 : vector<1x128xf32> to vector<16x128xf32>
    %33 = arith.addf %30, %32 : vector<16x128xf32>
    %34 = arith.addf %26, %33 : vector<16x128xf32>
    %c0_30 = arith.constant 0 : index
    %c0_31 = arith.constant 0 : index
    %c0_32 = arith.constant 0 : index
    %35 = vector.load %arg5[%c0_30, %c0_31, %c0_32] : memref<1x16x128xf32, #tpu.memory_space<vmem>>, vector<1x16x128xf32>
    %36 = vector.shape_cast %35 : vector<1x16x128xf32> to vector<16x128xf32>
    %37 = vector.shape_cast %34 : vector<16x128xf32> to vector<1x16x128xf32>
    tpu.vector_store %arg5[%c0_30, %c0_31, %c0_32], %37 {strides = array<i32>} : memref<1x16x128xf32, #tpu.memory_space<vmem>>, vector<1x16x128xf32>,
    return
  }
  func.func @transform_0(%arg0: i32) -> (i32, i32, i32) {
    %c0_i32 = arith.constant 0 : i32
    %c0_i32_0 = arith.constant 0 : i32
    %c0_i32_1 = arith.constant 0 : i32
    return %arg0, %c0_i32, %c0_i32_0 : i32, i32, i32
  }
  func.func @transform_1(%arg0: i32) -> (i32, i32, i32) {
    %c0_i32 = arith.constant 0 : i32
    %c0_i32_0 = arith.constant 0 : i32
    %c0_i32_1 = arith.constant 0 : i32
    %c0_i32_2 = arith.constant 0 : i32
    return %c0_i32, %c0_i32_0, %c0_i32_1 : i32, i32, i32
  }
  func.func @transform_2(%arg0: i32) -> (i32, i32) {
    %c0_i32 = arith.constant 0 : i32
    %c0_i32_0 = arith.constant 0 : i32
    %c0_i32_1 = arith.constant 0 : i32
    return %c0_i32, %c0_i32_0 : i32, i32
  }
  func.func @transform_3(%arg0: i32) -> (i32, i32) {
    %c0_i32 = arith.constant 0 : i32
    %c0_i32_0 = arith.constant 0 : i32
    %c0_i32_1 = arith.constant 0 : i32
    return %c0_i32, %c0_i32_0 : i32, i32
  }
  func.func @transform_4(%arg0: i32) -> (i32, i32, i32) {
    %c0_i32 = arith.constant 0 : i32
    %c0_i32_0 = arith.constant 0 : i32
    %c0_i32_1 = arith.constant 0 : i32
    return %arg0, %c0_i32, %c0_i32_0 : i32, i32, i32
  }
}

</mosaic_0001>

<bundles_post_ra>
// kernel: tpu_custom_call.1
= control target key start
LH: loop header
LB: loop body
LE: loop exit
PB: predicated region body
PF: predicated region fallthrough
CT: control target
= control target key end

     0   :  { %9 = vsyncpa [#allocation3], 0  ;;  %s1230_s0 = inlined_call_operand.vmem [shape: bf16[2,18,72], index: 0, kind: input, shape index: {}]   ;;  %s1231_s1 = inlined_call_operand.hbm [shape: bf16[3,72,128], index: 1, kind: input, shape index: {}]   ;;  %s1232_s2 = inlined_call_operand.vmem [shape: bf16[72,128], index: 2, kind: input, shape index: {}]   ;;  %s1233_s3 = inlined_call_operand.vmem [shape: f32[2,128], index: 3, kind: input, shape index: {}]   ;;  %s1234_s4 = inlined_call_operand.hbm [shape: f32[2,16,128], index: 4, kind: output, shape index: {}]  }
   0x1   :  { %10 = vsyncpa [#allocation4], 0 }
   0x2   :  { %12 = vsyncpa [#allocation4 + $0x1], 0  ;;  %s1020_s15 = smov 0   ;;  %s1022_s16 = smov 0  }
   0x3   :  { %s1024_s17 = smov 0   ;;  %s1026_s18 = smov 0  }
   0x4 LB: > { %s1041_s19 = sadd.s32 4294967295, %s985_s18   ;;  %s688_s20 = sadd.s32 4294967294, %s985_s18   ;;  %s985_s18 = sphi %s1026_s18, %s1250_s18   ;;  %s981_s17 = sphi %s1024_s17, %s1249_s17   ;;  %s977_s16 = sphi %s1022_s16, %s1248_s16   ;;  %s973_s15 = sphi %s1020_s15, %s1247_s15  }
   0x5   : > { %s1045_s21 = sadd.s32 1, %s985_s18   ;;  %s114_s22 = sadd.s32 1, %s981_s17 }
   0x6   : > { %s111_s23 = ssub.s32 %s985_s18, %s1045_s21  ;;  %p124_p0 = scmp.ne.s32.totalorder %s981_s17, %s977_s16 }
   0x7   : > { %p112_p1 = scmp.eq.s32.totalorder %s111_s23, 0  ;;  %p125_p2 = scmp.eq.s32.totalorder %s1041_s19, 1 }
   0x8   : > { %p130_p3 = scmp.ne.s32.totalorder %s977_s16, %s973_s15  ;;  %p131_p4 = scmp.eq.s32.totalorder %s688_s20, 1 }
   0x9   : > { %s1056_s24 = scalar_select %p112_p1, %s981_s17, %s114_s22  }
   0xa   : > { %p1058_p5 = por %p125_p2, %p124_p0  ;;  %p1062_p6 = por %p131_p4, %p130_p3 }
   0xb   : > { %p689_p7 = scmp.ge.s32.totalorder %s985_s18, 1  ;;  %p138_p8 = scmp.lt.s32.totalorder %s985_s18, 3 }
   0xc   : > { %s1238_s25 = scalar_select %p1058_p5, 1, 0 }
   0xd   : > { %s1239_s26 = scalar_select %p1062_p6, 1, 0 }
   0xe   : > { %p1235_p9 = scmp.eq.s32.totalorder %s1041_s19, 0  ;;  %p1069_p10 = pnand %p689_p7, %p138_p8 }
   0xf   : > { %s987_s28 = smov [#allocation2]   ;;  %s891_s7 = scalar_lea.hbm %s1231_s1, 1728 }
  0x10   : > { %s1240_s27 = scalar_select %p1069_p10, 1, 0 }
  0x11   : > { %s150_s29 = sshll.u32 %s987_s28, 4  ;;  %p818_p11 = pneg %p1069_p10  ;;  %s151_s29 = int_to_ptr.vmem [resolvable:$true] %s150_s29 }
  0x12   : > { %p892_p13 = scmp.ne.s32.totalorder %s1231_s1, %s891_s7  ;;  %p898_p3 = scmp.lt.u32.totalorder %s891_s7, %s1231_s1 }
  0x13   : > { %p1077_p12 = pnand %p1235_p9, %p818_p11 }
  0x15   : > { %p893_p0 = pneg %p1077_p12 }
  0x17   : > { %p894_p1 = pnand %p893_p0, %p892_p13 }
  0x19   : > { %p895_p2 = pneg %p894_p1 }
  0x1b   : > { %p900_p4 = pnand %p898_p3, %p895_p2 }
  0x1d   : > { %903 = shalt.err (!%p900_p4)
}
  0x1e   : > { %s904_s12 = scalar_lea.vmem %s151_s29, 1728  ;;  %p912_p9 = scmp.lt.s32.totalorder %s151_s29, %s151_s29 }
  0x1f   : > { %p905_p7 = scmp.ne.s32.totalorder %s151_s29, %s904_s12  ;;  %p913_p6 = scmp.lt.s32.totalorder %s904_s12, %s904_s12 }
  0x21   : > { %p907_p8 = pnand %p905_p7, %p893_p0  ;;  %p914_p5 = por %p913_p6, %p912_p9 }
  0x23   : > { %p908_p11 = pneg %p907_p8 }
  0x25   : > { %p915_p10 = pnand %p914_p5, %p908_p11 }
  0x27   : > { %918 = shalt.err (!%p915_p10)
}
  0x28   : > { %s988_s13 = smov 64   ;;  %s989_s14 = smov 4  }
  0x29   : > { %821 = dma.hbm_to_vmem [thread:$0]  (!%p1077_p12), %s1231_s1, 1728, %s151_s29, [#allocation3], %s988_s13, %s988_s13, %s989_s14  }
  0x2a   : > { %p1242_p13 = scmp.ne.s32.totalorder %s1240_s27, 0 }
  0x2b   : > { %p1243_p1 = scmp.eq.s32.totalorder (!%p1242_p13), %s1041_s19, 0 }
  0x2c   : > { %180 = sbr.rel (%p1242_p13) target bundleno = 332 (0x14c), region = 36 }
  0x33   : > { %964 = dma.done.wait (%p1243_p1), [#allocation3], 1728   ;;  %p1244_p0 = pmov %p1243_p1 }
  0x34   : > { %v990_v0 = vmov 0.0   ;;  %p206_p5 = scmp.lt.s32.totalorder %s1041_s19, 1  ;;  %vm991_vm0 = vmmov 0   ;;  %v868_v1 = vld [vmem:[#allocation2 + $0x24] sm:$0xff]   ;;  %v870_v3 = vld [vmem:[#allocation2 + $0x2c] sm:$0xff]   ;;  %v872_v5 = vld [vmem:[#allocation2 + $0x34] sm:$0xff]  }
  0x35   : > { %966 = vsyncadd (%p1244_p0), [#allocation3], 4294965568  ;;  %755 = vmatprep.subr.bf16.mxu0 %v990_v0  ;;  %769 = vmatprep.subr.bf16.mxu1 %v990_v0  ;;  %v869_v2 = vld [vmem:[#allocation2] sm:$0xff]   ;;  %v871_v4 = vld [vmem:[#allocation2 + $0x8] sm:$0xff]   ;;  %vm242_vm1 = vsmask.f32 7424 }
  0x36   : > { %765 = vmatprep.mubr.msk.bf16.mxu0 %vm991_vm0, %v990_v0  ;;  %779 = vmatprep.mubr.msk.bf16.mxu1 %vm991_vm0, %v990_v0  ;;  %s207_s23 = scalar_select %p206_p5, %s1041_s19, 1  ;;  %v873_v6 = vld [vmem:[#allocation2 + $0x10] sm:$0xff]   ;;  %v874_v7 = vld [vmem:[#allocation2 + $0x3c] sm:$0xff]   ;;  %vm286_vm2 = vcmask 1043456   ;;  %v876_v8 = vld [vmem:[#allocation2 + $0x44] ss:$0 sps:$4 sm:$0xff]  }
  0x37   : > { %756 = vmatpush3.bf16.msra.mxu0 %v868_v1  ;;  %770 = vmatpush3.bf16.msra.mxu1 %v869_v2  ;;  %v875_v11 = vld [vmem:[#allocation2 + $0x18] sm:$0xff]   ;;  %v877_v14 = vld [vmem:[#allocation2 + $0x20] ss:$0 sps:$4 sm:$0xff]   ;;  %v288_v18 = vsel %vm286_vm2, %v876_v8, 0  ;;  %vm282_vm3 = vcmask 588800   ;;  %v880_v24 = vld [vmem:[#allocation2 + $0x48] sm:$0xff]  }
  0x38   : > { %s811_s27 = smul.u32 12, %s207_s23  ;;  %757 = vmatprep.subr.bf16.mxu0 %v990_v0  ;;  %771 = vmatprep.subr.bf16.mxu1 %v990_v0  ;;  %v361_v21 = vsel %vm286_vm2, %v877_v14, 0  ;;  %v881_v25 = vld [vmem:[%s1232_s2] sm:$0xff]   ;;  %v882_v26 = vld [vmem:[#allocation2 + $0x50] sm:$0xff]   ;;  %v883_v27 = vld [vmem:[%s1232_s2 + $0x8] sm:$0xff]   ;;  %vm418_vm4 = vcmask 1046528  }
  0x39   : > { %v884_v28 = vld [vmem:[#allocation2 + $0x58] sm:$0xff]   ;;  %v885_v29 = vld [vmem:[%s1232_s2 + $0x10] sm:$0xff]   ;;  %v886_v31 = vld [vmem:[#allocation2 + $0x60] sm:$0xff]   ;;  %s203_s20 = sand.u32 1, %s977_s16   ;;  %s730_s6 = sshll.u32 %s1041_s19, 8 }
  0x3a   : > { %s1116_s30 = scalar_lea.vmem %s1230_s0, %s811_s27  ;;  %v887_v33 = vld [vmem:[%s1232_s2 + $0x18] sm:$0xff]   ;;  %v888_v34 = vld [vmem:[#allocation2 + $0x68] ss:$0 sps:$4 sm:$0xff]   ;;  %v889_v35 = vld [vmem:[%s1232_s2 + $0x20] ss:$0 sps:$4 sm:$0xff]   ;;  %s694_s27 = sshll.u32 %s203_s20, 4 }
  0x3b   : > { %758 = vmatpush3.bf16.msra.mxu0 %v870_v3  ;;  %772 = vmatpush3.bf16.msra.mxu1 %v871_v4  ;;  %v212_v9 = vld [vmem:[%s1116_s30] sm:$0xf]  ;;  %v213_v10 = vld [vmem:[%s1116_s30 + $0x4] sm:$0xf]  ;;  %v453_v38 = vsel %vm286_vm2, %v888_v34, 0  ;;  %v553_v39 = vsel %vm286_vm2, %v889_v35, 0  ;;  %s1185_s9 = scalar_lea.hbm %s1234_s4, %s730_s6 }
  0x3c   : > { %759 = vmatprep.subr.bf16.mxu0 %v990_v0  ;;  %773 = vmatprep.subr.bf16.mxu1 %v990_v0  ;;  %v696_v12 = vcombine.low %v212_v9, %v213_v10  ;;  %v1123_v13 = vld [vmem:[%s1116_s30 + $0x8] ss:$0 sps:$4 sm:$0x11]   ;;  %v404_v30 = vld [vmem:[%s1116_s30] sm:$0xe]  ;;  %s205_s30 = scalar_lea.vmem [#allocation5], %s694_s27 }
  0x3d   : > { %v251_v17 = vshll.u32 %v1123_v13, 16  ;;  %v710_v32 = vcombine.low %v404_v30, %v213_v10  ;;  %v420_v37 = vrot.slane %v1123_v13, 1  ;;  %v717_v52 = vld [vmem:[%s1233_s3] ss:$0 sm:$0xff]  ;;  %v718_v55 = vld [vmem:[%s1233_s3 + $0x1] ss:$0 sm:$0xff] }
  0x3e   : > { %v244_v15 = vshrl.u32 %v696_v12, 16  ;;  %v246_v16 = vshll.u32 %v696_v12, 16  ;;  %s614_s5 = sshll.u32 %s205_s30, 4  ;;  %s1189_s10 = scalar_lea.sflag [#allocation4], %s203_s20  ;;  %s1180_s5 = int_to_ptr.vmem [resolvable:$true] %s614_s5 }
  0x3f   : > { %760 = vmatpush3.bf16.msra.mxu0 %v872_v5  ;;  %774 = vmatpush3.bf16.msra.mxu1 %v873_v6  ;;  %v253_v20 = vrot.slane %v251_v17, 1  ;;  %v419_v36 = vrot.slane %v710_v32, 1  ;;  %s919_s19 = scalar_lea.vmem %s1180_s5, 256  ;;  %p1245_p9 = scmp.ne.s32.totalorder %s1238_s25, 0 }
  0x40   : > { %761 = vmatprep.subr.bf16.mxu0 %v990_v0  ;;  %775 = vmatprep.subr.bf16.mxu1 %v990_v0  ;;  %v248_v19 = vrot.slane %v246_v16, 1  ;;  %p920_p6 = scmp.ne.s32.totalorder %s1180_s5, %s919_s19  ;;  %s992_s11 = smov [#allocation5]  }
  0x41   : > { %v421_v40 = vsel %vm418_vm4, %v419_v36, %v420_v37  ;;  %s923_s12 = sshll.u32 %s992_s11, 4  ;;  %s924_s12 = int_to_ptr.vmem [resolvable:$false] %s923_s12 }
  0x42   : > { %v249_v22 = vor.u32 %v248_v19, %v244_v15  ;;  %p921_p10 = pnand %p920_p6, %p1245_p9  ;;  %s925_s13 = scalar_lea.vmem %s924_s12, 512 }
  0x43   : > { %762 = vmatpush3.bf16.msra.mxu0 %v874_v7  ;;  %776 = vmatpush3.bf16.msra.mxu1 %v875_v11  ;;  %p926_p2 = scmp.lt.s32.totalorder %s1180_s5, %s924_s12  ;;  %p927_p3 = scmp.lt.s32.totalorder %s925_s13, %s919_s19 }
  0x44   : > { %763 = vmatprep.subr.bf16.mxu0 %v990_v0  ;;  %777 = vmatprep.subr.bf16.mxu1 %v990_v0  ;;  %v254_v23 = vsel %vm242_vm1, %v249_v22, %v253_v20  ;;  %p922_p12 = pneg %p921_p10 }
  0x45   : > { %p928_p4 = por %p927_p3, %p926_p2 }
  0x47   : > { %764 = vmatpush3.bf16.msra.mxu0 %v288_v18  ;;  %778 = vmatpush3.bf16.msra.mxu1 %v361_v21  ;;  %p929_p7 = pnand %p928_p4, %p922_p12 }
  0x48   : > { %783 = vmatprep.subr.bf16.mxu0 %v990_v0  ;;  %797 = vmatprep.subr.bf16.mxu1 %v990_v0 }
  0x4a   : > { %766 = vmatmul.mubr.msk.bf16.vlgmr.msra.gmra.mrb[0].mxu0 %vm282_vm3, %v254_v23  ;;  %780 = vmatmul.mubr.msk.bf16.vlgmr.msra.gmra.mrb[0].mxu1 %vm282_vm3, %v696_v12 }
  0x4b   : > { %784 = vmatpush3.bf16.msra.mxu0 %v880_v24  ;;  %798 = vmatpush3.bf16.msra.mxu1 %v881_v25 }
  0x4c   : > { %785 = vmatprep.subr.bf16.mxu0 %v990_v0  ;;  %799 = vmatprep.subr.bf16.mxu1 %v990_v0 }
  0x4d   : > { %793 = vmatprep.mubr.msk.bf16.mxu0 %vm991_vm0, %v990_v0  ;;  %807 = vmatprep.mubr.msk.bf16.mxu1 %vm991_vm0, %v990_v0 }
  0x4f   : > { %786 = vmatpush3.bf16.msra.mxu0 %v882_v26  ;;  %800 = vmatpush3.bf16.msra.mxu1 %v883_v27 }
  0x50   : > { %787 = vmatprep.subr.bf16.mxu0 %v990_v0  ;;  %801 = vmatprep.subr.bf16.mxu1 %v990_v0 }
  0x53   : > { %788 = vmatpush3.bf16.msra.mxu0 %v884_v28  ;;  %802 = vmatpush3.bf16.msra.mxu1 %v885_v29 }
  0x54   : > { %789 = vmatprep.subr.bf16.mxu0 %v990_v0  ;;  %803 = vmatprep.subr.bf16.mxu1 %v990_v0 }
  0x57   : > { %790 = vmatpush3.bf16.msra.mxu0 %v886_v31  ;;  %804 = vmatpush3.bf16.msra.mxu1 %v887_v33 }
  0x58   : > { %791 = vmatprep.subr.bf16.mxu0 %v990_v0  ;;  %805 = vmatprep.subr.bf16.mxu1 %v990_v0 }
  0x5b   : > { %792 = vmatpush3.bf16.msra.mxu0 %v453_v38  ;;  %806 = vmatpush3.bf16.msra.mxu1 %v553_v39 }
  0x5e   : > { %794 = vmatmul.mubr.msk.bf16.vlgmr.msra.gmra.mrb[4].mxu0 %vm282_vm3, %v421_v40  ;;  %808 = vmatmul.mubr.msk.bf16.vlgmr.msra.gmra.mrb[4].mxu1 %vm282_vm3, %v254_v23 }
 0x11d   : > { %v324_v41 = vpop.f32.mrb[0].mxu0  ;;  %v397_v42 = vpop.f32.mrb[0].mxu1 }
 0x11e   : > { %v767_v43 = vpop.f32.mrb[1].mxu0  ;;  %v398_v44 = vadd.f32 %v397_v42, %v324_v41  ;;  %v781_v45 = vpop.f32.mrb[1].mxu1 }
 0x11f   : > { %v327_v46 = vpop.f32.mrb[2].mxu0  ;;  %v400_v47 = vpop.f32.mrb[2].mxu1 }
 0x120   : > { %v768_v48 = vpop.f32.mrb[3].mxu0  ;;  %v401_v49 = vadd.f32 %v400_v47, %v327_v46  ;;  %v782_v50 = vpop.f32.mrb[3].mxu1 }
 0x131   : > { %v489_v51 = vpop.f32.mrb[4].mxu0  ;;  %v589_v56 = vpop.f32.mrb[4].mxu1 }
 0x132   : > { %v496_v53 = vadd.f32 %v489_v51, %v398_v44  ;;  %v795_v54 = vpop.f32.mrb[5].mxu0  ;;  %v809_v58 = vpop.f32.mrb[5].mxu1  ;;  %v590_v63 = vadd.f32 %v718_v55, %v589_v56 }
 0x133   : > { %v492_v57 = vpop.f32.mrb[6].mxu0  ;;  %v592_v62 = vpop.f32.mrb[6].mxu1 }
 0x134   : > { %v503_v59 = vadd.f32 %v717_v52, %v496_v53  ;;  %v497_v60 = vadd.f32 %v492_v57, %v401_v49  ;;  %v796_v61 = vpop.f32.mrb[7].mxu0  ;;  %v810_v0 = vpop.f32.mrb[7].mxu1  ;;  %v593_v6 = vadd.f32 %v718_v55, %v592_v62 }
 0x136   : > { %v507_v1 = vmul.f32 0.1, %v503_v59  ;;  %v504_v2 = vadd.f32 %v717_v52, %v497_v60  ;;  %vm505_vm5 = vcmp.ge.f32.partialorder %v503_v59, 0.0 }
 0x138   : > { %v508_v3 = vmul.f32 0.1, %v504_v2  ;;  %v509_v4 = vsel %vm505_vm5, %v503_v59, %v507_v1  ;;  %vm506_vm6 = vcmp.ge.f32.partialorder %v504_v2, 0.0 }
 0x139   : > { %v596_v5 = vadd.f32 %v590_v63, %v509_v4 }
 0x13a   : > { %v510_v7 = vsel %vm506_vm6, %v504_v2, %v508_v3 }
 0x13b   : > { %598 = vst [vmem:[%s205_s30] sm:$0xff] %v596_v5  ;;  %v597_v8 = vadd.f32 %v593_v6, %v510_v7 }
 0x13d   : > { %599 = vst [vmem:[%s205_s30 + $0x8] sm:$0xff] %v597_v8 }
 0x13e   : > { %932 = shalt.err (!%p929_p7)
}
 0x13f   : > { %s933_s14 = scalar_lea.hbm %s1185_s9, 256  ;;  %s937_s23 = scalar_lea.hbm %s1234_s4, 512 }
 0x140   : > { %p934_p8 = scmp.ne.s32.totalorder %s1185_s9, %s933_s14  ;;  %p938_p1 = scmp.lt.u32.totalorder %s1185_s9, %s1234_s4 }
 0x141   : > { %p939_p0 = scmp.lt.u32.totalorder %s937_s23, %s933_s14  ;;  %p941_p6 = scmp.lt.u32.totalorder %s933_s14, %s1185_s9 }
 0x142   : > { %p935_p11 = pnand %p934_p8, %p1245_p9 }
 0x143   : > { %p940_p5 = por %p939_p0, %p938_p1 }
 0x144   : > { %p936_p13 = pneg %p935_p11 }
 0x145   : > { %p942_p10 = por %p941_p6, %p940_p5 }
 0x147   : > { %p943_p12 = pnand %p942_p10, %p936_p13 }
 0x149   : > { %946 = shalt.err (!%p943_p12)
}
 0x14a   : > { %s993_s29 = smov 128   ;;  %s994_s30 = smov 8  }
 0x14b   : > { %816 = dma.vmem_to_hbm [thread:$0]  (%p1245_p9), %s1180_s5, 256, %s1185_s9, %s1189_s10, %s993_s29, %s993_s29, %s994_s30  }
 0x14c PF: > { %p828_p2 = scmp.ge.s32.totalorder %s985_s18, 2  ;;  %s629_s6 = sand.u32 1, %s973_s15  }
 0x14d   : > { %p1246_p3 = scmp.ne.s32.totalorder %s1239_s26, 0  ;;  %s630_s7 = scalar_lea.sflag [#allocation4], %s629_s6 }
 0x14f   : > { %p823_p4 = pnand %p828_p2, %p1246_p3 }
 0x151   : > { %968 = dma.done.wait (!%p823_p4), %s630_s7, 256  }
 0x152   : > { %970 = vsyncadd (!%p823_p4), %s630_s7, 4294967040  ;;  %p15_p7 = scmp.ge.s32.totalorder %s1045_s21, 4   ;;  %s1247_s15 = smov %s977_s16 }
 0x153   : > { %s1248_s16 = smov %s981_s17  ;;  %s1249_s17 = smov %s1056_s24 }
 0x154   : > { %s1250_s18 = smov %s1045_s21  ;;  %17 = sbr.rel (!%p15_p7) target bundleno = 4 (0x4), region = 78 }
 0x15b   :  { %635 = vsyncpa [#allocation3], 1 }
 0x15c   :  { %637 = vsyncpa [#allocation3 + $0x1], 1 }
 0x15d   :  { %638 = vsyncpa [#allocation4], 1 }
 0x15e   :  { %640 = vsyncpa [#allocation4 + $0x1], 1 }

</bundles_post_ra>
